<compile_context>
chip_gen: v7x
topology: tpu7x:2x2x1
jax: 0.10.0
libtpu: 0.0.40
codegen_flags: <defaults>
</compile_context>

<pallas_src>
import functools

import jax
import jax.numpy as jnp
import numpy as np
from jax.experimental import pallas as pl
from jax.experimental.pallas import tpu as pltpu


def _round_up(x, m):
    return (x + m - 1) // m * m


def _cdiv(a, b):
    return -(-a // b)


def _pick_tile(extent, cap, align):
    """Fewest blocks <= cap, tile rounded up to `align`; returns (tile, n_blocks)."""
    n_blocks = _cdiv(extent, cap)
    tile = _round_up(_cdiv(extent, n_blocks), align)
    n_blocks = _cdiv(extent, tile)
    return tile, n_blocks


def _paged_ranker_kernel(scores_ref, target_ref, out_ref,
                         rank_acc, valid_acc, *,
                         ks, m, B, N, mask_rows, mask_cols):
    b_idx = pl.program_id(0)
    n_idx = pl.program_id(1)
    TB, TN = scores_ref.shape

    # ---- init phase: zero the per-row running sums at the first N tile ----
    @pl.when(n_idx == 0)
    def _():
        rank_acc[...] = jnp.zeros_like(rank_acc)
        valid_acc[...] = jnp.zeros_like(valid_acc)

    # ---- streaming phase: 2 compares + 2 lane reductions per tile ----
    s = scores_ref[...].astype(jnp.float32)          # [TB, TN] (upcast in-regs)
    t = target_ref[...]                              # [TB, 1]  f32 target score

    valid_hit = s > -10000.0
    rank_hit = t < s
    if mask_cols:                                    # static: only if N % TN != 0
        col = jax.lax.broadcasted_iota(jnp.int32, (1, TN), 1) + n_idx * TN
        in_bounds = col < N
        valid_hit = valid_hit & in_bounds
        rank_hit = rank_hit & in_bounds
    valid_acc[...] += jnp.sum(valid_hit.astype(jnp.float32), axis=-1, keepdims=True)
    rank_acc[...] += jnp.sum(rank_hit.astype(jnp.float32), axis=-1, keepdims=True)

    # ---- finalize phase: metric epilogue once per B block (last N tile) ----
    @pl.when(n_idx == pl.num_programs(1) - 1)
    def _():
        rank = rank_acc[...]                         # [TB, 1]
        valid = valid_acc[...]                       # [TB, 1]

        cols = []
        for k in ks:                                 # static python loop
            indicator = (rank < float(k)).astype(jnp.float32)
            cols.append(indicator / jnp.log2(rank + 2.0))   # ndcg@k contribution
            cols.append(indicator)                          # hr@k contribution
        cols.append(1.0 / (rank + 1.0))                     # mrr contribution
        cols.append(1.0 - rank / valid)                     # 1 - rank/valid_length

        per_row = jnp.concatenate(cols, axis=-1)            # [TB, M]
        if mask_rows:                                # static: only if B % TB != 0
            row = jax.lax.broadcasted_iota(jnp.int32, (TB, 1), 0) + b_idx * TB
            # where (not mul) -> NaN/inf from garbage edge rows is zeroed safely.
            per_row = jnp.where(row < B, per_row, 0.0)
        sums = jnp.sum(per_row, axis=0, keepdims=True)      # [1, M] block partial sums

        # Lane-dense (8,128) output slab; wrapper reads row 0, lanes [:M].
        slab = jnp.concatenate(
            [sums, jnp.zeros((1, 128 - m), jnp.float32)], axis=-1)  # [1, 128]
        out_ref[...] = jnp.broadcast_to(slab, (8, 128))


@functools.partial(jax.jit, static_argnames=("ks",))
def paged_ranker_metrics(scores, labels, ks):
    ks = tuple(ks)
    B, N = scores.shape
    m = 2 * len(ks) + 2
    assert m <= 128, "metric vector must fit in one 128-lane row"

    labels = jnp.reshape(labels, (B, 1)).astype(jnp.int32)
    # Pre-gather the target score per row (breaks the gather->rank dependency so the
    # kernel is a single tiled pass over N).
    target = jnp.take_along_axis(scores, labels, axis=1).astype(jnp.float32)  # [B, 1]

    # Tile sizes: sublane alignment follows dtype packing (8/16/32), lanes 128.
    # Caps (256, 2048) keep the double-buffered scores tile <= 4 MiB f32 on every chip.
    itemsize = jnp.dtype(scores.dtype).itemsize
    tb_align = {4: 8, 2: 16, 1: 32}.get(itemsize, 8)
    TB, nb = _pick_tile(B, 256, tb_align)
    TN, nn = _pick_tile(N, 2048, 128)

    kernel = functools.partial(
        _paged_ranker_kernel, ks=ks, m=m, B=B, N=N,
        mask_rows=(B % TB) != 0, mask_cols=(N % TN) != 0)

    cost = pl.CostEstimate(
        flops=4 * B * N,
        transcendentals=B * (len(ks) + 2),
        bytes_accessed=B * N * itemsize + 2 * B * 4 + nb * 8 * 128 * 4,
    )

    out = pl.pallas_call(
        kernel,
        out_shape=jax.ShapeDtypeStruct((nb * 8, 128), jnp.float32),
        grid_spec=pltpu.PrefetchScalarGridSpec(
            num_scalar_prefetch=0,
            grid=(nb, nn),                                    # N reduction axis last
            in_specs=[
                pl.BlockSpec((TB, TN), lambda b, n: (b, n)),  # scores tile
                pl.BlockSpec((TB, 1), lambda b, n: (b, 0)),   # target score
            ],
            out_specs=pl.BlockSpec((8, 128), lambda b, n: (b, 0)),
            scratch_shapes=[
                pltpu.VMEM((TB, 1), jnp.float32),             # rank accumulator
                pltpu.VMEM((TB, 1), jnp.float32),             # valid_length accumulator
            ],
        ),
        compiler_params=pltpu.CompilerParams(
            dimension_semantics=("parallel", "arbitrary"),
            vmem_limit_bytes=32 * 1024 * 1024,
        ),
        cost_estimate=cost,
    )(scores, target)

    # Combine per-B-block partial sums (row 0, first m lanes of each slab) -> mean.
    sums = out.reshape(nb, 8, 128)[:, 0, :m].sum(axis=0)
    return sums / B


class PagedRanker:
    """JAX/Pallas port of the PyTorch PagedRanker metric module."""

    def __init__(self, metrics_ks):
        self.ks = tuple(metrics_ks)

    def metrics(self, scores, labels):
        """Device-array [M] result; no host sync (preferred in training loops)."""
        return paged_ranker_metrics(jnp.asarray(scores), jnp.asarray(labels), self.ks)

    def __call__(self, scores, labels):
        # Host conversion mirrors the PyTorch .item() API (floats + trailing None).
        vals = np.asarray(jax.block_until_ready(self.metrics(scores, labels)))
        return [float(v) for v in vals] + [None]


def _reference(scores, labels, ks):
    scores = np.asarray(scores, dtype=np.float32)
    labels = np.asarray(labels).reshape(-1)
    b = scores.shape[0]
    predicts = scores[np.arange(b), labels][:, None]
    valid_length = (scores > -10000.0).sum(-1).astype(np.float32)
    rank = (predicts < scores).sum(-1).astype(np.float32)
    res = []
    for k in ks:
        ind = (rank < k).astype(np.float32)
        res.append(float((1.0 / np.log2(rank + 2) * ind).mean()))
        res.append(float(ind.mean()))
    res.append(float((1.0 / (rank + 1)).mean()))
    res.append(float((1.0 - rank / valid_length).mean()))
    return res


if __name__ == "__main__":
    ks = [1, 5, 10]
    ranker = PagedRanker(ks)
    key = jax.random.PRNGKey(0)

    cases = [
        # (B, N, dtype)
        (8, 128, jnp.float32),       # exactly tiled, no masking path
        (20, 1200, jnp.float32),     # ragged N (lane mask), single B block
        (300, 640, jnp.float32),     # multiple B blocks + ragged last B block
        (20, 1200, jnp.bfloat16),    # bf16-in-HBM path, per-tile upcast in kernel
    ]

    for B, N, dtype in cases:
        key, k_scores, k_labels = jax.random.split(key, 3)
        scores = jax.random.normal(k_scores, (B, N), dtype=jnp.float32)
        # Mask the last N//8 candidates of even rows (padded-candidate path).
        pad_mask = (jnp.arange(N)[None, :] >= N - N // 8) & \
                   (jnp.arange(B)[:, None] % 2 == 0)
        scores = jnp.where(pad_mask, -20000.0, scores).astype(dtype)
        labels = jax.random.randint(k_labels, (B, 1), 0, N - N // 8, dtype=jnp.int32)

        result = ranker(scores, labels)
        ref = _reference(np.asarray(scores.astype(jnp.float32)),
                         np.asarray(labels), ks)
        assert result[-1] is None
        np.testing.assert_allclose(np.array(result[:-1]), np.array(ref),
                                   rtol=1e-5, atol=1e-5)

    print("KERNEL_OK")
</pallas_src>

<mosaic_0001>
module attributes {stable_mosaic.version = 11 : i64} {
  func.func @_paged_ranker_kernel(%arg0: i32, %arg1: i32, %arg2: memref<8x128xf32, #tpu.memory_space<vmem>>, %arg3: memref<8x1xf32, #tpu.memory_space<vmem>>, %arg4: memref<8x128xf32, #tpu.memory_space<vmem>>, %arg5: memref<8x1xf32, #tpu.memory_space<vmem>>, %arg6: memref<8x1xf32, #tpu.memory_space<vmem>>) attributes {dimension_semantics = [#tpu.dimension_semantics<parallel>, #tpu.dimension_semantics<arbitrary>], iteration_bounds = array<i64: 1, 1>, scalar_prefetch = 0 : i64, scratch_operands = 2 : i64, tpu.core_type = #tpu.core_type<tc>, window_params = [{transform_indices = @transform_0, window_bounds = array<i64: 8, 128>}, {transform_indices = @transform_1, window_bounds = array<i64: 8, 1>}, {transform_indices = @transform_2, window_bounds = array<i64: 8, 128>}]} {
    %c0_i32 = arith.constant 0 : i32
    %0 = arith.cmpi eq, %arg1, %c0_i32 : i32
    %1 = arith.extui %0 : i1 to i32
    %c0_i32_0 = arith.constant 0 : i32
    %2 = arith.cmpi ne, %1, %c0_i32_0 : i32
    scf.if %2 {
      %cst_16 = arith.constant 0.000000e+00 : f32
      %26 = vector.broadcast %cst_16 : f32 to vector<8x1xf32>
      %c0_17 = arith.constant 0 : index
      %c0_18 = arith.constant 0 : index
      %27 = vector.load %arg5[%c0_17, %c0_18] : memref<8x1xf32, #tpu.memory_space<vmem>>, vector<8x1xf32>
      tpu.vector_store %arg5[%c0_17, %c0_18], %26 {strides = array<i32>} : memref<8x1xf32, #tpu.memory_space<vmem>>, vector<8x1xf32>,
      %cst_19 = arith.constant 0.000000e+00 : f32
      %28 = vector.broadcast %cst_19 : f32 to vector<8x1xf32>
      %c0_20 = arith.constant 0 : index
      %c0_21 = arith.constant 0 : index
      %29 = vector.load %arg6[%c0_20, %c0_21] : memref<8x1xf32, #tpu.memory_space<vmem>>, vector<8x1xf32>
      tpu.vector_store %arg6[%c0_20, %c0_21], %28 {strides = array<i32>} : memref<8x1xf32, #tpu.memory_space<vmem>>, vector<8x1xf32>,
    } else {
    }
    %c0 = arith.constant 0 : index
    %c0_1 = arith.constant 0 : index
    %3 = vector.load %arg2[%c0, %c0_1] : memref<8x128xf32, #tpu.memory_space<vmem>>, vector<8x128xf32>
    %c0_2 = arith.constant 0 : index
    %c0_3 = arith.constant 0 : index
    %4 = vector.load %arg3[%c0_2, %c0_3] : memref<8x1xf32, #tpu.memory_space<vmem>>, vector<8x1xf32>
    %cst = arith.constant -1.000000e+04 : f32
    %5 = vector.broadcast %cst : f32 to vector<8x128xf32>
    %6 = arith.cmpf ogt, %3, %5 : vector<8x128xf32>
    %7 = vector.broadcast %4 : vector<8x1xf32> to vector<8x128xf32>
    %8 = arith.cmpf olt, %7, %3 : vector<8x128xf32>
    %c0_4 = arith.constant 0 : index
    %c0_5 = arith.constant 0 : index
    %9 = vector.load %arg6[%c0_4, %c0_5] : memref<8x1xf32, #tpu.memory_space<vmem>>, vector<8x1xf32>
    %10 = arith.extui %6 : vector<8x128xi1> to vector<8x128xi32>
    %11 = arith.sitofp %10 : vector<8x128xi32> to vector<8x128xf32>
    %cst_6 = arith.constant dense<0.000000e+00> : vector<8xf32>
    %12 = vector.multi_reduction <add>, %11, %cst_6 [1] : vector<8x128xf32> to vector<8xf32>
    %13 = vector.shape_cast %12 : vector<8xf32> to vector<8x1xf32>
    %14 = arith.addf %9, %13 : vector<8x1xf32>
    %c0_7 = arith.constant 0 : index
    %c0_8 = arith.constant 0 : index
    %15 = vector.load %arg6[%c0_7, %c0_8] : memref<8x1xf32, #tpu.memory_space<vmem>>, vector<8x1xf32>
    tpu.vector_store %arg6[%c0_7, %c0_8], %14 {strides = array<i32>} : memref<8x1xf32, #tpu.memory_space<vmem>>, vector<8x1xf32>,
    %c0_9 = arith.constant 0 : index
    %c0_10 = arith.constant 0 : index
    %16 = vector.load %arg5[%c0_9, %c0_10] : memref<8x1xf32, #tpu.memory_space<vmem>>, vector<8x1xf32>
    %17 = arith.extui %8 : vector<8x128xi1> to vector<8x128xi32>
    %18 = arith.sitofp %17 : vector<8x128xi32> to vector<8x128xf32>
    %cst_11 = arith.constant dense<0.000000e+00> : vector<8xf32>
    %19 = vector.multi_reduction <add>, %18, %cst_11 [1] : vector<8x128xf32> to vector<8xf32>
    %20 = vector.shape_cast %19 : vector<8xf32> to vector<8x1xf32>
    %21 = arith.addf %16, %20 : vector<8x1xf32>
    %c0_12 = arith.constant 0 : index
    %c0_13 = arith.constant 0 : index
    %22 = vector.load %arg5[%c0_12, %c0_13] : memref<8x1xf32, #tpu.memory_space<vmem>>, vector<8x1xf32>
    tpu.vector_store %arg5[%c0_12, %c0_13], %21 {strides = array<i32>} : memref<8x1xf32, #tpu.memory_space<vmem>>, vector<8x1xf32>,
    %c0_i32_14 = arith.constant 0 : i32
    %23 = arith.cmpi eq, %arg1, %c0_i32_14 : i32
    %24 = arith.extui %23 : i1 to i32
    %c0_i32_15 = arith.constant 0 : i32
    %25 = arith.cmpi ne, %24, %c0_i32_15 : i32
    scf.if %25 {
      %c0_16 = arith.constant 0 : index
      %c0_17 = arith.constant 0 : index
      %26 = vector.load %arg5[%c0_16, %c0_17] : memref<8x1xf32, #tpu.memory_space<vmem>>, vector<8x1xf32>
      %c0_18 = arith.constant 0 : index
      %c0_19 = arith.constant 0 : index
      %27 = vector.load %arg6[%c0_18, %c0_19] : memref<8x1xf32, #tpu.memory_space<vmem>>, vector<8x1xf32>
      %cst_20 = arith.constant 1.000000e+00 : f32
      %28 = vector.broadcast %cst_20 : f32 to vector<8x1xf32>
      %29 = arith.cmpf olt, %26, %28 : vector<8x1xf32>
      %30 = arith.extui %29 : vector<8x1xi1> to vector<8x1xi32>
      %31 = arith.sitofp %30 : vector<8x1xi32> to vector<8x1xf32>
      %cst_21 = arith.constant 2.000000e+00 : f32
      %32 = vector.broadcast %cst_21 : f32 to vector<8x1xf32>
      %33 = arith.addf %26, %32 : vector<8x1xf32>
      %34 = math.log %33 : vector<8x1xf32>
      %cst_22 = arith.constant 2.000000e+00 : f32
      %35 = math.log %cst_22 : f32
      %36 = vector.broadcast %35 : f32 to vector<8x1xf32>
      %37 = arith.divf %34, %36 : vector<8x1xf32>
      %38 = arith.divf %31, %37 : vector<8x1xf32>
      %cst_23 = arith.constant 5.000000e+00 : f32
      %39 = vector.broadcast %cst_23 : f32 to vector<8x1xf32>
      %40 = arith.cmpf olt, %26, %39 : vector<8x1xf32>
      %41 = arith.extui %40 : vector<8x1xi1> to vector<8x1xi32>
      %42 = arith.sitofp %41 : vector<8x1xi32> to vector<8x1xf32>
      %cst_24 = arith.constant 2.000000e+00 : f32
      %43 = vector.broadcast %cst_24 : f32 to vector<8x1xf32>
      %44 = arith.addf %26, %43 : vector<8x1xf32>
      %45 = math.log %44 : vector<8x1xf32>
      %cst_25 = arith.constant 2.000000e+00 : f32
      %46 = math.log %cst_25 : f32
      %47 = vector.broadcast %46 : f32 to vector<8x1xf32>
      %48 = arith.divf %45, %47 : vector<8x1xf32>
      %49 = arith.divf %42, %48 : vector<8x1xf32>
      %cst_26 = arith.constant 1.000000e+01 : f32
      %50 = vector.broadcast %cst_26 : f32 to vector<8x1xf32>
      %51 = arith.cmpf olt, %26, %50 : vector<8x1xf32>
      %52 = arith.extui %51 : vector<8x1xi1> to vector<8x1xi32>
      %53 = arith.sitofp %52 : vector<8x1xi32> to vector<8x1xf32>
      %cst_27 = arith.constant 2.000000e+00 : f32
      %54 = vector.broadcast %cst_27 : f32 to vector<8x1xf32>
      %55 = arith.addf %26, %54 : vector<8x1xf32>
      %56 = math.log %55 : vector<8x1xf32>
      %cst_28 = arith.constant 2.000000e+00 : f32
      %57 = math.log %cst_28 : f32
      %58 = vector.broadcast %57 : f32 to vector<8x1xf32>
      %59 = arith.divf %56, %58 : vector<8x1xf32>
      %60 = arith.divf %53, %59 : vector<8x1xf32>
      %cst_29 = arith.constant 1.000000e+00 : f32
      %61 = vector.broadcast %cst_29 : f32 to vector<8x1xf32>
      %62 = arith.addf %26, %61 : vector<8x1xf32>
      %cst_30 = arith.constant 1.000000e+00 : f32
      %63 = vector.broadcast %cst_30 : f32 to vector<8x1xf32>
      %64 = arith.divf %63, %62 : vector<8x1xf32>
      %65 = arith.divf %26, %27 : vector<8x1xf32>
      %cst_31 = arith.constant 1.000000e+00 : f32
      %66 = vector.broadcast %cst_31 : f32 to vector<8x1xf32>
      %67 = arith.subf %66, %65 : vector<8x1xf32>
      %68 = tpu.concatenate %38, %31, %49, %42, %60, %53, %64, %67 in 1 : vector<8x1xf32>, vector<8x1xf32>, vector<8x1xf32>, vector<8x1xf32>, vector<8x1xf32>, vector<8x1xf32>, vector<8x1xf32>, vector<8x1xf32> -> vector<8x8xf32>
      %cst_32 = arith.constant dense<0.000000e+00> : vector<8xf32>
      %69 = vector.multi_reduction <add>, %68, %cst_32 [0] : vector<8x8xf32> to vector<8xf32>
      %70 = vector.shape_cast %69 : vector<8xf32> to vector<1x8xf32>
      %cst_33 = arith.constant 0.000000e+00 : f32
      %71 = vector.broadcast %cst_33 : f32 to vector<1x120xf32>
      %72 = tpu.concatenate %70, %71 in 1 : vector<1x8xf32>, vector<1x120xf32> -> vector<1x128xf32>
      %73 = vector.shape_cast %72 : vector<1x128xf32> to vector<1x128xf32>
      %74 = vector.broadcast %73 : vector<1x128xf32> to vector<8x128xf32>
      %c0_34 = arith.constant 0 : index
      %c0_35 = arith.constant 0 : index
      %75 = vector.load %arg4[%c0_34, %c0_35] : memref<8x128xf32, #tpu.memory_space<vmem>>, vector<8x128xf32>
      tpu.vector_store %arg4[%c0_34, %c0_35], %74 {strides = array<i32>} : memref<8x128xf32, #tpu.memory_space<vmem>>, vector<8x128xf32>,
    } else {
    }
    return
  }
  func.func @transform_0(%arg0: i32, %arg1: i32) -> (i32, i32) {
    %c0_i32 = arith.constant 0 : i32
    return %arg0, %arg1 : i32, i32
  }
  func.func @transform_1(%arg0: i32, %arg1: i32) -> (i32, i32) {
    %c0_i32 = arith.constant 0 : i32
    %c0_i32_0 = arith.constant 0 : i32
    return %arg0, %c0_i32 : i32, i32
  }
  func.func @transform_2(%arg0: i32, %arg1: i32) -> (i32, i32) {
    %c0_i32 = arith.constant 0 : i32
    %c0_i32_0 = arith.constant 0 : i32
    return %arg0, %c0_i32 : i32, i32
  }
}

</mosaic_0001>

<bundles_post_ra>
// kernel: paged_ranker_metrics.1
= control target key start
LH: loop header
LB: loop body
LE: loop exit
PB: predicated region body
PF: predicated region fallthrough
CT: control target
= control target key end

     0   :  { %v153_v0 = vmov 0   ;;  %v154_v3 = vmov 0.0   ;;  %vm15_vm1 = vcmask 7168   ;;  %s157_s13 = smov 5   ;;  %s158_s14 = smov 6   ;;  %vm100_vm6 = vcmask 15360   ;;  %s191_s1 = inlined_call_operand.vmem [shape: f32[8,1], index: 1, kind: input, shape index: {}]   ;;  %s192_s0 = inlined_call_operand.vmem [shape: f32[8,128], index: 0, kind: input, shape index: {}]   ;;  %s193_s2 = inlined_call_operand.vmem [shape: f32[8,128], index: 2, kind: output, shape index: {}]  }
   0x1   :  { %144 = vset.pattern.permute.xlu0 %v153_v0  ;;  %v19_v1 = vld [vmem:[%s191_s1] sm:$0xff]  ;;  %17 = vst.msk [vmem:[#allocation3] sm:$0xff] %vm15_vm1, %v154_v3  ;;  %16 = vst.msk [vmem:[#allocation2] sm:$0xff] %vm15_vm1, %v154_v3  ;;  %s156_s1 = smov 3   ;;  %s159_s15 = smov 2   ;;  %vm102_vm7 = vcmask 23552   ;;  %v121_v47 = vlaneseq }
   0x2   :  { %v18_v2 = vld [vmem:[%s192_s0] sm:$0xff]  ;;  %23 = vperm.xlu0 %144, %v19_v1   ;;  %s155_s0 = smov 1   ;;  %s160_s16 = smov 4   ;;  %vm104_vm8 = vcmask 31744   ;;  %vm106_vm9 = vcmask 39936   ;;  %vm108_vm10 = vcmask 48128  }
   0x3   :  { %vm20_vm0 = vcmp.gt.f32.partialorder %v18_v2, -10000.0  ;;  %s161_s17 = smov 7   ;;  %vm110_vm11 = vcmask 56320   ;;  %vm112_vm12 = vcmask 64512   ;;  %v122_v50 = vshrl.u32 %v121_v47, 7 }
   0x4   :  { %v130_v4 = vsel %vm20_vm0, 1.0, %v154_v3 }
   0x5   :  { %30 = vadd.xlane.f32.xlu1 %v130_v4  ;;  %v123_v53 = vsub.s32 0, %v122_v50 }
   0x8   :  { %v27_v7 = vld [vmem:[#allocation3] sm:$0xff]  ;;  %v35_v10 = vld [vmem:[#allocation2] sm:$0xff] }
  0x81   :  { %v24_v5 = vpop.permute.xlu0 %23 }
  0x82   :  { %vm26_vm2 = vcmp.lt.f32.partialorder %v24_v5, %v18_v2 }
  0x83   :  { %v131_v6 = vsel %vm26_vm2, 1.0, %v154_v3 }
  0x84   :  { %38 = vadd.xlane.f32.xlu0 %v131_v6 }
  0x92   :  { %v31_v8 = vpop.xlane.xlu1 %30 }
  0x93   :  { %v32_v9 = vadd.f32 %v31_v8, %v27_v7 }
  0x95   :  { %34 = vst.msk [vmem:[#allocation3] sm:$0xff] %vm15_vm1, %v32_v9 }
  0x9c   :  { %v46_v23 = vld [vmem:[#allocation3] sm:$0xff] }
 0x111   :  { %v39_v11 = vpop.xlane.xlu0 %38 }
 0x112   :  { %v40_v12 = vadd.f32 %v39_v11, %v35_v10 }
 0x114   :  { %41 = vst.msk [vmem:[#allocation2] sm:$0xff] %vm15_vm1, %v40_v12 }
 0x11b   :  { %v45_v13 = vld [vmem:[#allocation2] sm:$0xff] }
 0x11c   :  { %vm47_vm3 = vcmp.lt.f32.partialorder %v45_v13, 1.0  ;;  %v50_v14 = vadd.f32 2.0, %v45_v13  ;;  %v65_v15 = vadd.f32 1.0, %v45_v13  ;;  %vm57_vm4 = vcmp.lt.f32.partialorder %v45_v13, 5.0 }
 0x11d   :  { %v132_v16 = vsel %vm47_vm3, 1.0, %v154_v3  ;;  %v133_v17 = vsel %vm57_vm4, 1.0, %v154_v3  ;;  %vm61_vm5 = vcmp.lt.f32.partialorder %v45_v13, 10.0 }
 0x11e   :  { %145 = vlog2.f32 %v50_v14  ;;  %72 = vrot.lane.b32.xlu1 %v132_v16, %s155_s0  ;;  %v134_v18 = vsel %vm61_vm5, 1.0, %v154_v3 }
 0x11f   :  { %147 = vrcp.f32 %v65_v15 }
 0x122   :  { %80 = vrot.lane.b32.xlu1 %v133_v17, %s156_s1 }
 0x126   :  { %88 = vrot.lane.b32.xlu1 %v134_v18, %s157_s13 }
 0x128   :  { %v146_v19 = vpop.eup %145 }
 0x129   :  { %v148_v20 = vpop.eup %147  ;;  %v52_v21 = vmul.f32 0.6931472, %v146_v19 }
 0x12a   :  { %92 = vrot.lane.b32.xlu0 %v148_v20, %s158_s14 }
 0x12b   :  { %v54_v22 = vmul.f32 1.442695, %v52_v21 }
 0x12d   :  { %149 = vrcp.f32 %v54_v22 }
 0x12e   :  { %151 = vrcp.f32 %v46_v23 }
 0x137   :  { %v150_v24 = vpop.eup %149 }
 0x138   :  { %v56_v25 = vmul.f32 %v150_v24, %v132_v16  ;;  %v60_v26 = vmul.f32 %v150_v24, %v133_v17  ;;  %v152_v27 = vpop.eup %151  ;;  %v64_v28 = vmul.f32 %v150_v24, %v134_v18 }
 0x139   :  { %v69_v29 = vmul.f32 %v152_v27, %v45_v13 }
 0x13a   :  { %76 = vrot.lane.b32.xlu1 %v60_v26, %s159_s15 }
 0x13b   :  { %v70_v30 = vsub.f32 1.0, %v69_v29 }
 0x13e   :  { %84 = vrot.lane.b32.xlu1 %v64_v28, %s160_s16 }
 0x142   :  { %96 = vrot.lane.b32.xlu1 %v70_v30, %s161_s17 }
 0x190   :  { %v73_v31 = vpop.permute.xlu1 %72 }
 0x191   :  { %v99_v34 = vsel %vm15_vm1, %v56_v25, %v73_v31 }
 0x194   :  { %v81_v32 = vpop.permute.xlu1 %80 }
 0x198   :  { %v89_v33 = vpop.permute.xlu1 %88 }
 0x19c   :  { %v93_v40 = vpop.permute.xlu0 %92 }
 0x1ac   :  { %v77_v35 = vpop.permute.xlu1 %76 }
 0x1ad   :  { %v101_v36 = vsel %vm100_vm6, %v99_v34, %v77_v35 }
 0x1ae   :  { %v103_v37 = vsel %vm102_vm7, %v101_v36, %v81_v32 }
 0x1b0   :  { %v85_v38 = vpop.permute.xlu1 %84 }
 0x1b1   :  { %v105_v39 = vsel %vm104_vm8, %v103_v37, %v85_v38 }
 0x1b2   :  { %v107_v41 = vsel %vm106_vm9, %v105_v39, %v89_v33 }
 0x1b3   :  { %v109_v42 = vsel %vm108_vm10, %v107_v41, %v93_v40 }
 0x1b4   :  { %v97_v43 = vpop.permute.xlu1 %96 }
 0x1b5   :  { %v111_v44 = vsel %vm110_vm11, %v109_v42, %v97_v43 }
 0x1b6   :  { %v113_v45 = vsel %vm112_vm12, %v111_v44, 0.0 }
 0x1b7   :  { %v114_v46 = vrot.slane %v113_v45, 4 }
 0x1b9   :  { %v115_v48 = vadd.f32 %v114_v46, %v113_v45 }
 0x1bb   :  { %v116_v49 = vrot.slane %v115_v48, 2 }
 0x1bd   :  { %v117_v51 = vadd.f32 %v116_v49, %v115_v48 }
 0x1bf   :  { %v118_v52 = vrot.slane %v117_v51, 1 }
 0x1c1   :  { %v119_v54 = vadd.f32 %v118_v52, %v117_v51 }
 0x1c3   :  { %v120_v55 = vsel %vm112_vm12, %v119_v54, 0.0 }
 0x1c4   :  { %v124_v56 = vrot.slane %v120_v55, %v123_v53 }
 0x1c6   :  { %125 = vst [vmem:[%s193_s2] sm:$0xff] %v124_v56 }

</bundles_post_ra>
